<compile_context>
chip_gen: v7x
topology: tpu7x:2x2x1
jax: 0.10.0
libtpu: 0.0.40
codegen_flags: <defaults>
</compile_context>

<pallas_src>
import jax
import jax.numpy as jnp
from jax.experimental import pallas as pl
from jax.experimental.pallas import tpu as pltpu


def rbert_head_kernel(hidden_ref, pooler_ref, masks_ref, inv_ref,
                      w_ref, b_ref, out_ref):
    """Fused RBERT head for one batch tile.

    hidden_ref : (bB, N, D)   bf16/f32  BERT last_hidden_state tile (streamed)
    pooler_ref : (bB, D)      f32       BERT pooler_output tile
    masks_ref  : (bB, 2, N)   hidden dtype   stacked [e1, e2] 0/1 masks
    inv_ref    : (bB, 2)      f32       exact 1 / mask_count (from wrapper)
    w_ref      : (3, D, Lp)   f32       folded weights [W_cls', W_e1', W_e2']
    b_ref      : (1, Lp)      f32       folded bias
    out_ref    : (bB, Lp)     f32       logits (lane-padded)
    """
    # entity_average numerator on the MXU: (bB,2,N) x (bB,N,D) -> (bB,2,D), f32 acc
    sums = jnp.einsum('bkn,bnd->bkd', masks_ref[...], hidden_ref[...],
                      preferred_element_type=jnp.float32)
    avg = sums * inv_ref[...][:, :, None]            # exact f32 reciprocal counts
    ent = jnp.tanh(avg)                              # (bB, 2, D)
    cls = jnp.tanh(pooler_ref[...].astype(jnp.float32))   # (bB, D)

    # Folded classifier: three (bB,D)x(D,Lp) matmuls + one bias (MXU has slack;
    # the kernel is HBM-bound on the hidden stream).
    out = (jnp.dot(cls,            w_ref[0], preferred_element_type=jnp.float32)
           + jnp.dot(ent[:, 0, :], w_ref[1], preferred_element_type=jnp.float32)
           + jnp.dot(ent[:, 1, :], w_ref[2], preferred_element_type=jnp.float32)
           + b_ref[...])
    out_ref[...] = out.astype(out_ref.dtype)


def _choose_block_b(B, N, D, L_pad, hid_itemsize):
    """VMEM-aware batch tile (conservative so it also fits v7x's 64 MiB VMEM)."""
    budget = 28 * 1024 * 1024
    # streamed bytes per batch row, x2 for double buffering
    per_b = 2 * (N * D * hid_itemsize        # hidden
                 + 2 * N * hid_itemsize      # masks
                 + D * 4                     # pooler
                 + 2 * 4                     # inverse counts
                 + L_pad * 4)                # output
    resident = 2 * (3 * D * L_pad * 4 + L_pad * 4)   # weights (2 pipeline bufs)
    avail = max(budget - resident, per_b)
    bb = max(1, int(avail // per_b))
    bb = min(bb, 256, B)
    if bb >= 8:
        bb = (bb // 8) * 8                  # keep sublane alignment
    # ensure >= 2 grid steps when B allows it so v7x's second TC gets work
    if bb == B and B >= 16:
        bb = max(8, ((B // 2) // 8) * 8)
    return int(bb), per_b, resident


def rbert_head(last_hidden_state, pooler_output, e1_mask, e2_mask,
               w_cls, b_cls, w_ent, b_ent, w_clf, b_clf, *, block_b=None):
    """RBERT head (eval mode; dropout = identity).

    Pass `last_hidden_state` in bf16 (as the encoder should emit it) for 2x less
    HBM traffic; the kernel accumulates in f32 on the MXU either way.
    """
    B, N, D = last_hidden_state.shape
    L = w_clf.shape[1]
    hid_dtype = last_hidden_state.dtype
    hid_itemsize = jnp.dtype(hid_dtype).itemsize

    # ---- eval-time fold of fc_cls / fc_entity into the classifier ------------
    # (In production this fold is done once at weight-load time, not per call.)
    wc0, wc1, wc2 = w_clf[:D], w_clf[D:2 * D], w_clf[2 * D:]
    w_fold = jnp.stack([w_cls @ wc0, w_ent @ wc1, w_ent @ wc2], axis=0)   # (3,D,L)
    b_fold = b_cls @ wc0 + b_ent @ (wc1 + wc2) + b_clf                    # (L,)

    # ---- lane-dense classifier output: pad L up to a multiple of 128 ---------
    L_pad = max(128, ((L + 127) // 128) * 128)
    w_fused = jnp.zeros((3, D, L_pad), jnp.float32).at[:, :, :L].set(
        w_fold.astype(jnp.float32))
    b_fused = jnp.zeros((1, L_pad), jnp.float32).at[0, :L].set(
        b_fold.astype(jnp.float32))

    # ---- masks: one stacked (B,2,N) stream in the hidden dtype; counts stay f32
    masks32 = jnp.stack([e1_mask, e2_mask], axis=1).astype(jnp.float32)   # (B,2,N)
    counts = jnp.sum(masks32, axis=-1)                                    # (B,2)
    # TODO(synk): an all-zero entity mask yields avg = 0 here (torch would give NaN).
    inv_counts = 1.0 / jnp.where(counts == 0.0, 1.0, counts)              # f32
    masks = masks32.astype(hid_dtype)

    pooler = pooler_output.astype(jnp.float32)

    # ---- VMEM-aware batch tile + explicit scoped-VMEM limit -------------------
    bb_auto, per_b, resident = _choose_block_b(B, N, D, L_pad, hid_itemsize)
    if block_b is None:
        block_b = bb_auto
    est_vmem = per_b * block_b + resident
    vmem_limit = int(min(max(est_vmem + (4 << 20), 32 << 20), 56 << 20))

    grid = (pl.cdiv(B, block_b),)   # no jnp.pad of the big tensor: boundary
                                    # blocks are handled by partial DMAs.

    # TODO(synk): the dominant remaining win is gathering only the entity-span
    # rows of last_hidden_state (scalar-prefetched offsets + manual DMA) instead
    # of streaming all N rows; skipped because the module accepts arbitrary
    # (possibly non-contiguous) 0/1 masks, so full-N semantics are kept.
    out = pl.pallas_call(
        rbert_head_kernel,
        out_shape=jax.ShapeDtypeStruct((B, L_pad), jnp.float32),
        grid=grid,
        in_specs=[
            pl.BlockSpec((block_b, N, D), lambda i: (i, 0, 0)),   # hidden (streamed)
            pl.BlockSpec((block_b, D),    lambda i: (i, 0)),      # pooler
            pl.BlockSpec((block_b, 2, N), lambda i: (i, 0, 0)),   # masks
            pl.BlockSpec((block_b, 2),    lambda i: (i, 0)),      # 1/count (f32)
            # folded weights: constant index_map -> fetched once, VMEM-resident
            pl.BlockSpec((3, D, L_pad),   lambda i: (0, 0, 0)),
            pl.BlockSpec((1, L_pad),      lambda i: (0, 0)),
        ],
        out_specs=pl.BlockSpec((block_b, L_pad), lambda i: (i, 0)),
        compiler_params=pltpu.CompilerParams(
            dimension_semantics=("parallel",),
            vmem_limit_bytes=vmem_limit),
    )(last_hidden_state, pooler, masks, inv_counts, w_fused, b_fused)

    return out[:, :L]


def rbert_head_ref(hidden, pooler, e1m, e2m, w_cls, b_cls, w_ent, b_ent, w_clf, b_clf):
    cls = jnp.tanh(pooler) @ w_cls + b_cls
    e1a = (e1m[:, None, :] @ hidden)[:, 0, :] / e1m.sum(1, keepdims=True)
    e2a = (e2m[:, None, :] @ hidden)[:, 0, :] / e2m.sum(1, keepdims=True)
    e1 = jnp.tanh(e1a) @ w_ent + b_ent
    e2 = jnp.tanh(e2a) @ w_ent + b_ent
    concat = jnp.concatenate([cls, e1, e2], axis=-1)
    return concat @ w_clf + b_clf


if __name__ == "__main__":
    B, N, D, V, L = 2, 8, 32, 100, 10   # batch, seq, hidden, vocab, num_labels

    key = jax.random.PRNGKey(0)
    ks = jax.random.split(key, 10)

    # ---- synthetic, deterministic "BERT" stand-in (plain JAX glue) ----
    # TODO(synk): the full pretrained BertModel encoder (12-layer transformer)
    # is not re-implemented; its outputs are emulated deterministically below.
    emb_table = jax.random.normal(ks[0], (V, D), jnp.float32) * 0.02
    w_pool = jax.random.normal(ks[1], (D, D), jnp.float32) * 0.02
    b_pool = jnp.zeros((D,), jnp.float32)

    input_ids = jax.random.randint(ks[2], (B, N), 0, V)
    input_mask = jnp.ones((B, N), jnp.float32)      # consumed only by BERT attn
    pos = jnp.arange(N)
    e1_mask = jnp.broadcast_to(((pos >= 1) & (pos <= 2)).astype(jnp.float32), (B, N))
    e2_mask = jnp.broadcast_to(((pos >= 4) & (pos <= 6)).astype(jnp.float32), (B, N))

    # Encoder emits the hidden state in bf16 (streamed dtype of the kernel).
    last_hidden_bf16 = emb_table[input_ids].astype(jnp.bfloat16)            # (B,N,D)
    last_hidden_f32 = last_hidden_bf16.astype(jnp.float32)
    pooler_output = jnp.tanh(last_hidden_f32[:, 0, :] @ w_pool + b_pool)    # (B, D)

    # ---- RBERT head parameters (deterministic init) ----
    w_cls = jax.random.normal(ks[3], (D, D), jnp.float32) * 0.02
    b_cls = jax.random.normal(ks[4], (D,), jnp.float32) * 0.02
    w_ent = jax.random.normal(ks[5], (D, D), jnp.float32) * 0.02
    b_ent = jax.random.normal(ks[6], (D,), jnp.float32) * 0.02
    w_clf = jax.random.normal(ks[7], (3 * D, L), jnp.float32) * 0.02
    b_clf = jax.random.normal(ks[8], (L,), jnp.float32) * 0.02

    out = rbert_head(last_hidden_bf16, pooler_output, e1_mask, e2_mask,
                     w_cls, b_cls, w_ent, b_ent, w_clf, b_clf)
    out = jax.block_until_ready(out)

    ref = rbert_head_ref(last_hidden_f32, pooler_output, e1_mask, e2_mask,
                         w_cls, b_cls, w_ent, b_ent, w_clf, b_clf)
    assert out.shape == (B, L), out.shape
    assert jnp.allclose(out, ref, atol=1e-3, rtol=1e-2), (out, ref)

    print("KERNEL_OK")
</pallas_src>

<mosaic_0001>
module attributes {stable_mosaic.version = 11 : i64} {
  func.func @rbert_head_kernel(%arg0: i32, %arg1: memref<2x8x32xbf16, #tpu.memory_space<vmem>>, %arg2: memref<2x32xf32, #tpu.memory_space<vmem>>, %arg3: memref<2x2x8xbf16, #tpu.memory_space<vmem>>, %arg4: memref<2x2xf32, #tpu.memory_space<vmem>>, %arg5: memref<3x32x128xf32, #tpu.memory_space<vmem>>, %arg6: memref<1x128xf32, #tpu.memory_space<vmem>>, %arg7: memref<2x128xf32, #tpu.memory_space<vmem>>) attributes {dimension_semantics = [#tpu.dimension_semantics<parallel>], iteration_bounds = array<i64: 1>, scalar_prefetch = 0 : i64, scratch_operands = 0 : i64, tpu.core_type = #tpu.core_type<tc>, window_params = [{transform_indices = @transform_0, window_bounds = array<i64: 2, 8, 32>}, {transform_indices = @transform_1, window_bounds = array<i64: 2, 32>}, {transform_indices = @transform_2, window_bounds = array<i64: 2, 2, 8>}, {transform_indices = @transform_3, window_bounds = array<i64: 2, 2>}, {pipeline_mode = #tpu.pipeline_mode<synchronous>, transform_indices = @transform_4, window_bounds = array<i64: 3, 32, 128>}, {pipeline_mode = #tpu.pipeline_mode<synchronous>, transform_indices = @transform_5, window_bounds = array<i64: 1, 128>}, {transform_indices = @transform_6, window_bounds = array<i64: 2, 128>}]} {
    %c0 = arith.constant 0 : index
    %c0_0 = arith.constant 0 : index
    %c0_1 = arith.constant 0 : index
    %0 = vector.load %arg3[%c0, %c0_0, %c0_1] : memref<2x2x8xbf16, #tpu.memory_space<vmem>>, vector<2x2x8xbf16>
    %c0_2 = arith.constant 0 : index
    %c0_3 = arith.constant 0 : index
    %c0_4 = arith.constant 0 : index
    %1 = vector.load %arg1[%c0_2, %c0_3, %c0_4] : memref<2x8x32xbf16, #tpu.memory_space<vmem>>, vector<2x8x32xbf16>
    "tpu.trace_start"() <{level = 10 : i32, message = "bkn,bnd->bkd"}> : () -> ()
    %cst = arith.constant dense<0.000000e+00> : vector<2x2x32xf32>
    %2 = tpu.matmul %0, %1, %cst {dimension_numbers = #tpu.dot_dimension_numbers<[2], [1], [1], [2], [0, 0, 0, 1, 1, 2], [0], [0]>} : vector<2x2x8xbf16>, vector<2x8x32xbf16>, vector<2x2x32xf32> -> vector<2x2x32xf32>
    "tpu.trace_stop"() : () -> ()
    %c0_5 = arith.constant 0 : index
    %c0_6 = arith.constant 0 : index
    %3 = vector.load %arg4[%c0_5, %c0_6] : memref<2x2xf32, #tpu.memory_space<vmem>>, vector<2x2xf32>
    %4 = vector.shape_cast %3 : vector<2x2xf32> to vector<2x2x1xf32>
    %5 = vector.broadcast %4 : vector<2x2x1xf32> to vector<2x2x32xf32>
    %6 = arith.mulf %2, %5 : vector<2x2x32xf32>
    %7 = math.tanh %6 : vector<2x2x32xf32>
    %c0_7 = arith.constant 0 : index
    %c0_8 = arith.constant 0 : index
    %8 = vector.load %arg2[%c0_7, %c0_8] : memref<2x32xf32, #tpu.memory_space<vmem>>, vector<2x32xf32>
    %9 = math.tanh %8 : vector<2x32xf32>
    %c0_9 = arith.constant 0 : index
    %c0_10 = arith.constant 0 : index
    %c0_11 = arith.constant 0 : index
    %10 = vector.load %arg5[%c0_9, %c0_10, %c0_11] : memref<3x32x128xf32, #tpu.memory_space<vmem>>, vector<1x32x128xf32>
    %11 = vector.shape_cast %10 : vector<1x32x128xf32> to vector<32x128xf32>
    %cst_12 = arith.constant dense<0.000000e+00> : vector<2x128xf32>
    %12 = tpu.matmul %9, %11, %cst_12 {dimension_numbers = #tpu.dot_dimension_numbers<[1], [0], [0], [1], [0, 0, 1, 1], [], []>} : vector<2x32xf32>, vector<32x128xf32>, vector<2x128xf32> -> vector<2x128xf32>
    %13 = vector.extract_strided_slice %7 {offsets = [0, 0, 0], sizes = [2, 1, 32], strides = [1, 1, 1]} : vector<2x2x32xf32> to vector<2x1x32xf32>
    %14 = vector.shape_cast %13 : vector<2x1x32xf32> to vector<2x32xf32>
    %c1 = arith.constant 1 : index
    %c0_13 = arith.constant 0 : index
    %c0_14 = arith.constant 0 : index
    %15 = vector.load %arg5[%c1, %c0_13, %c0_14] : memref<3x32x128xf32, #tpu.memory_space<vmem>>, vector<1x32x128xf32>
    %16 = vector.shape_cast %15 : vector<1x32x128xf32> to vector<32x128xf32>
    %cst_15 = arith.constant dense<0.000000e+00> : vector<2x128xf32>
    %17 = tpu.matmul %14, %16, %cst_15 {dimension_numbers = #tpu.dot_dimension_numbers<[1], [0], [0], [1], [0, 0, 1, 1], [], []>} : vector<2x32xf32>, vector<32x128xf32>, vector<2x128xf32> -> vector<2x128xf32>
    %18 = arith.addf %12, %17 : vector<2x128xf32>
    %19 = vector.extract_strided_slice %7 {offsets = [0, 1, 0], sizes = [2, 1, 32], strides = [1, 1, 1]} : vector<2x2x32xf32> to vector<2x1x32xf32>
    %20 = vector.shape_cast %19 : vector<2x1x32xf32> to vector<2x32xf32>
    %c2 = arith.constant 2 : index
    %c0_16 = arith.constant 0 : index
    %c0_17 = arith.constant 0 : index
    %21 = vector.load %arg5[%c2, %c0_16, %c0_17] : memref<3x32x128xf32, #tpu.memory_space<vmem>>, vector<1x32x128xf32>
    %22 = vector.shape_cast %21 : vector<1x32x128xf32> to vector<32x128xf32>
    %cst_18 = arith.constant dense<0.000000e+00> : vector<2x128xf32>
    %23 = tpu.matmul %20, %22, %cst_18 {dimension_numbers = #tpu.dot_dimension_numbers<[1], [0], [0], [1], [0, 0, 1, 1], [], []>} : vector<2x32xf32>, vector<32x128xf32>, vector<2x128xf32> -> vector<2x128xf32>
    %24 = arith.addf %18, %23 : vector<2x128xf32>
    %c0_19 = arith.constant 0 : index
    %c0_20 = arith.constant 0 : index
    %25 = vector.load %arg6[%c0_19, %c0_20] : memref<1x128xf32, #tpu.memory_space<vmem>>, vector<1x128xf32>
    %26 = vector.broadcast %25 : vector<1x128xf32> to vector<2x128xf32>
    %27 = arith.addf %24, %26 : vector<2x128xf32>
    %c0_21 = arith.constant 0 : index
    %c0_22 = arith.constant 0 : index
    %28 = vector.load %arg7[%c0_21, %c0_22] : memref<2x128xf32, #tpu.memory_space<vmem>>, vector<2x128xf32>
    tpu.vector_store %arg7[%c0_21, %c0_22], %27 {strides = array<i32>} : memref<2x128xf32, #tpu.memory_space<vmem>>, vector<2x128xf32>,
    return
  }
  func.func @transform_0(%arg0: i32) -> (i32, i32, i32) {
    %c0_i32 = arith.constant 0 : i32
    %c0_i32_0 = arith.constant 0 : i32
    %c0_i32_1 = arith.constant 0 : i32
    return %arg0, %c0_i32, %c0_i32_0 : i32, i32, i32
  }
  func.func @transform_1(%arg0: i32) -> (i32, i32) {
    %c0_i32 = arith.constant 0 : i32
    %c0_i32_0 = arith.constant 0 : i32
    return %arg0, %c0_i32 : i32, i32
  }
  func.func @transform_2(%arg0: i32) -> (i32, i32, i32) {
    %c0_i32 = arith.constant 0 : i32
    %c0_i32_0 = arith.constant 0 : i32
    %c0_i32_1 = arith.constant 0 : i32
    return %arg0, %c0_i32, %c0_i32_0 : i32, i32, i32
  }
  func.func @transform_3(%arg0: i32) -> (i32, i32) {
    %c0_i32 = arith.constant 0 : i32
    %c0_i32_0 = arith.constant 0 : i32
    return %arg0, %c0_i32 : i32, i32
  }
  func.func @transform_4(%arg0: i32) -> (i32, i32, i32) {
    %c0_i32 = arith.constant 0 : i32
    %c0_i32_0 = arith.constant 0 : i32
    %c0_i32_1 = arith.constant 0 : i32
    %c0_i32_2 = arith.constant 0 : i32
    return %c0_i32, %c0_i32_0, %c0_i32_1 : i32, i32, i32
  }
  func.func @transform_5(%arg0: i32) -> (i32, i32) {
    %c0_i32 = arith.constant 0 : i32
    %c0_i32_0 = arith.constant 0 : i32
    %c0_i32_1 = arith.constant 0 : i32
    return %c0_i32, %c0_i32_0 : i32, i32
  }
  func.func @transform_6(%arg0: i32) -> (i32, i32) {
    %c0_i32 = arith.constant 0 : i32
    %c0_i32_0 = arith.constant 0 : i32
    return %arg0, %c0_i32 : i32, i32
  }
}

</mosaic_0001>

<bundles_post_ra>
// kernel: tpu_custom_call.1
= control target key start
LH: loop header
LB: loop body
LE: loop exit
PB: predicated region body
PF: predicated region fallthrough
CT: control target
= control target key end

     0   :  { %11 = vsyncpa [#allocation3], 0  ;;  %s724_s0 = inlined_call_operand.hbm [shape: bf16[2,8,32], index: 0, kind: input, shape index: {}]   ;;  %s725_s1 = inlined_call_operand.vmem [shape: f32[2,32], index: 1, kind: input, shape index: {}]   ;;  %s726_s2 = inlined_call_operand.vmem [shape: bf16[2,2,8], index: 2, kind: input, shape index: {}]   ;;  %s727_s3 = inlined_call_operand.vmem [shape: f32[2,2], index: 3, kind: input, shape index: {}]   ;;  %s728_s4 = inlined_call_operand.hbm [shape: f32[3,32,128], index: 4, kind: input, shape index: {}]   ;;  %s729_s5 = inlined_call_operand.vmem [shape: f32[1,128], index: 5, kind: input, shape index: {}]   ;;  %s730_s6 = inlined_call_operand.hbm [shape: f32[2,128], index: 6, kind: output, shape index: {}]  }
   0x1   :  { %12 = vsyncpa [#allocation6], 0 }
   0x2   :  { %13 = vsyncpa [#allocation4], 0  ;;  %s613_s21 = smov [#allocation2]   ;;  %s541_s25 = scalar_lea.hbm %s724_s0, 128 }
   0x3   :  { %s19_s22 = sshll.u32 %s613_s21, 4  ;;  %p542_p0 = scmp.ne.s32.totalorder %s724_s0, %s541_s25  ;;  %s20_s22 = int_to_ptr.vmem [resolvable:$true] %s19_s22 }
   0x4   :  { %p545_p1 = scmp.lt.u32.totalorder %s541_s25, %s724_s0 }
   0x6   :  { %p547_p2 = pnand %p545_p1, %p542_p0 }
   0x8   :  { %550 = shalt.err (!%p547_p2)
}
   0x9   :  { %s551_s30 = scalar_lea.vmem %s20_s22, 128  ;;  %p556_p4 = scmp.lt.s32.totalorder %s20_s22, %s20_s22 }
   0xa   :  { %p552_p3 = scmp.ne.s32.totalorder %s20_s22, %s551_s30  ;;  %p557_p5 = scmp.lt.s32.totalorder %s551_s30, %s551_s30 }
   0xc   :  { %p558_p6 = por %p557_p5, %p556_p4 }
   0xe   :  { %p559_p7 = pnand %p558_p6, %p552_p3 }
  0x10   :  { %562 = shalt.err (!%p559_p7)
}
  0x11   :  { %s614_s7 = smov 64   ;;  %s615_s8 = smov 4  }
  0x12   :  { %25 = dma.hbm_to_vmem [thread:$0]  %s724_s0, 128, %s20_s22, [#allocation3], %s614_s7, %s614_s7, %s615_s8  }
  0x13   :  { %s616_s11 = smov [#allocation5]   ;;  %s563_s15 = scalar_lea.hbm %s728_s4, 1536 }
  0x14   :  { %s37_s12 = sshll.u32 %s616_s11, 4  ;;  %p564_p8 = scmp.ne.s32.totalorder %s728_s4, %s563_s15  ;;  %s38_s12 = int_to_ptr.vmem [resolvable:$true] %s37_s12 }
  0x15   :  { %p567_p9 = scmp.lt.u32.totalorder %s563_s15, %s728_s4 }
  0x17   :  { %p569_p10 = pnand %p567_p9, %p564_p8 }
  0x19   :  { %572 = shalt.err (!%p569_p10)
}
  0x1a   :  { %s573_s20 = scalar_lea.vmem %s38_s12, 1536  ;;  %p578_p12 = scmp.lt.s32.totalorder %s38_s12, %s38_s12 }
  0x1b   :  { %p574_p11 = scmp.ne.s32.totalorder %s38_s12, %s573_s20  ;;  %p579_p13 = scmp.lt.s32.totalorder %s573_s20, %s573_s20 }
  0x1d   :  { %p580_p0 = por %p579_p13, %p578_p12 }
  0x1f   :  { %p581_p1 = pnand %p580_p0, %p574_p11 }
  0x21   :  { %584 = shalt.err (!%p581_p1)
}
  0x22   :  { %s617_s0 = smov 128   ;;  %s618_s21 = smov 8  }
  0x23   :  { %43 = dma.hbm_to_vmem [thread:$0]  %s728_s4, 1536, %s38_s12, [#allocation6], %s617_s0, %s617_s0, %s618_s21  }
  0x24   :  { %607 = dma.done.wait [#allocation3], 128  }
  0x25   :  { %608 = vsyncadd [#allocation3], 4294967168 }
  0x26   :  { %609 = dma.done.wait [#allocation6], 1536  }
  0x27   :  { %610 = vsyncadd [#allocation6], 4294965760  ;;  %v619_v0 = vmov 0.0   ;;  %v152_v1 = vlaneseq  ;;  %vm620_vm0 = vmmov 0   ;;  %vm61_vm1 = vcmask 1043456   ;;  %v177_v14 = vld [vmem:[#allocation5 + $0x20] sm:$0xff] }
  0x28   :  { %462 = vmatprep.subr.bf16.mxu0 %v619_v0  ;;  %468 = vmatprep.subr.bf16.mxu1 %v619_v0  ;;  %v55_v4 = vld [vmem:[#allocation2] sm:$0xf]  ;;  %v56_v5 = vld [vmem:[#allocation2 + $0x4] sm:$0xf]  ;;  %vm57_vm2 = vcmask 64512   ;;  %v178_v15 = vld [vmem:[#allocation5 + $0x28] sm:$0xff] }
  0x29   :  { %464 = vmatprep.mubr.msk.bf16.mxu0 %vm620_vm0, %v619_v0  ;;  %470 = vmatprep.mubr.msk.bf16.mxu1 %vm620_vm0, %v619_v0  ;;  %v153_v2 = vshrl.u32 %v152_v1, 7  ;;  %v63_v7 = vsel %vm61_vm1, %v55_v4, 0  ;;  %v109_v8 = vsel %vm61_vm1, %v56_v5, 0  ;;  %v151_v9 = vld [vmem:[%s727_s3] sm:$0x3]  ;;  %v172_v16 = vld [vmem:[#allocation5] sm:$0xff]  ;;  %v508_v18 = vpack.c.bf16 %v178_v15, %v177_v14 }
  0x2a   :  { %463 = vmatpush3.bf16.msra.mxu0 %v63_v7  ;;  %469 = vmatpush3.bf16.msra.mxu1 %v109_v8  ;;  %v53_v10 = vld [vmem:[%s726_s2] sm:$0x1]  ;;  %v54_v11 = vld [vmem:[%s726_s2 + $0x1] sm:$0x1]  ;;  %v621_v17 = vmov 0.0|0.0   ;;  %v173_v19 = vld [vmem:[#allocation5 + $0x8] sm:$0xff] }
  0x2b   :  { %v161_v3 = vsub.s32 1, %v153_v2  ;;  %v154_v6 = vsub.s32 0, %v153_v2  ;;  %507 = vmatprep.subr.bf16.mxu0 %v621_v17  ;;  %513 = vmatprep.subr.bf16.mxu1 %v621_v17  ;;  %v179_v20 = vld [vmem:[#allocation5 + $0x30] sm:$0xff]  ;;  %v180_v21 = vld [vmem:[#allocation5 + $0x38] sm:$0xff]  ;;  %v514_v22 = vpack.c.bf16 %v173_v19, %v172_v16  ;;  %vm186_vm3 = vcmask 261120   ;;  %v333_v41 = vld [vmem:[#allocation5 + $0x40] sm:$0xff] }
  0x2c   :  { %v174_v23 = vld [vmem:[#allocation5 + $0x10] sm:$0xff]  ;;  %v175_v24 = vld [vmem:[#allocation5 + $0x18] sm:$0xff]  ;;  %v511_v26 = vpack.c.bf16 %v180_v21, %v179_v20  ;;  %v334_v42 = vld [vmem:[#allocation5 + $0x48] sm:$0xff]  ;;  %vm184_vm4 = vcmask 1041409   ;;  %s622_s30 = smov [#allocation7]  }
  0x2d   :  { %v162_v12 = vrot.slane %v151_v9, %v161_v3  ;;  %v155_v13 = vrot.slane %v151_v9, %v154_v6  ;;  %465 = vmatmul.mubr.msk.bf16.vlgmr.msra.gmra.mrb[0].mxu0 %vm57_vm2, %v53_v10  ;;  %471 = vmatmul.mubr.msk.bf16.vlgmr.msra.gmra.mrb[0].mxu1 %vm57_vm2, %v54_v11  ;;  %v170_v25 = vld [vmem:[%s725_s1] sm:$0x3]  ;;  %v517_v27 = vpack.c.bf16 %v175_v24, %v174_v23  ;;  %v335_v48 = vld [vmem:[#allocation5 + $0x50] sm:$0xff]  ;;  %s427_s7 = sshll.u32 %s622_s30, 4  ;;  %s428_s7 = int_to_ptr.vmem [resolvable:$true] %s427_s7 }
  0x2e   :  { %482 = vmatprep.mubr.msk.f32.mxu0 %vm620_vm0, %v619_v0  ;;  %493 = vmatprep.mubr.msk.f32.mxu1 %vm620_vm0, %v619_v0  ;;  %535 = vtanh.f32 %v170_v25  ;;  %v520_v47 = vpack.c.bf16 %v334_v42, %v333_v41  ;;  %v336_v49 = vld [vmem:[#allocation5 + $0x58] sm:$0xff]  ;;  %s585_s8 = scalar_lea.vmem %s428_s7, 32  ;;  %p590_p3 = scmp.lt.s32.totalorder %s428_s7, %s428_s7 }
  0x2f   :  { %164 = vbcast.lane.b32.xlu0 %v162_v12, 256  ;;  %509 = vmatpush3.bf16.msra.mxu0 %v508_v18  ;;  %v523_v52 = vpack.c.bf16 %v336_v49, %v335_v48  ;;  %v442_v59 = vld [vmem:[%s729_s5] ss:$0 sm:$0xff]  ;;  %p586_p2 = scmp.ne.s32.totalorder %s428_s7, %s585_s8  ;;  %p591_p4 = scmp.lt.s32.totalorder %s585_s8, %s585_s8 }
  0x30   :  { %515 = vmatpush3.bf16.msra.mxu1 %v514_v22  ;;  %510 = vmatprep.subr.bf16.mxu0 %v621_v17 }
  0x31   :  { %516 = vmatprep.subr.bf16.mxu1 %v621_v17  ;;  %p592_p5 = por %p591_p4, %p590_p3 }
  0x33   :  { %157 = vbcast.lane.b32.xlu0 %v155_v13, 256  ;;  %512 = vmatpush3.bf16.msra.mxu0 %v511_v26  ;;  %p593_p6 = pnand %p592_p5, %p586_p2 }
  0x34   :  { %518 = vmatpush3.bf16.msra.mxu1 %v517_v27  ;;  %519 = vmatprep.subr.bf16.mxu0 %v621_v17 }
  0x38   :  { %v536_v28 = vpop.eup %535 }
  0x39   :  { %494 = vmatmul.mubr.msk.f32.vlgmr.msra.gmra.mrb[4].mxu1 %vm186_vm3, %v536_v28 }
  0xa1   :  { %v165_v29 = vpop.permute.xlu0 %164 }
  0xa5   :  { %v158_v30 = vpop.permute.xlu0 %157 }
 0x100   :  { %v99_v31 = vpop.f32.mrb[0].mxu0  ;;  %v145_v32 = vpop.f32.mrb[0].mxu1 }
 0x101   :  { %v166_v33 = vmul.f32 %v158_v30, %v99_v31  ;;  %v167_v34 = vmul.f32 %v165_v29, %v145_v32  ;;  %v466_v35 = vpop.f32.mrb[1].mxu0  ;;  %v472_v36 = vpop.f32.mrb[1].mxu1 }
 0x102   :  { %v102_v37 = vpop.f32.mrb[2].mxu0  ;;  %v148_v38 = vpop.f32.mrb[2].mxu1 }
 0x103   :  { %537 = vtanh.f32 %v166_v33  ;;  %v467_v39 = vpop.f32.mrb[3].mxu0  ;;  %v473_v40 = vpop.f32.mrb[3].mxu1 }
 0x104   :  { %539 = vtanh.f32 %v167_v34 }
 0x10c   :  { %v328_v53 = vpop.f32.mrb[4].mxu1 }
 0x10d   :  { %v538_v43 = vpop.eup %537  ;;  %v495_v54 = vpop.f32.mrb[5].mxu1 }
 0x10e   :  { %v540_v44 = vpop.eup %539  ;;  %v337_v45 = vrot.slane %v538_v43, 1 }
 0x10f   :  { %v183_v46 = vrot.slane %v540_v44, 7 }
 0x110   :  { %v338_v50 = vsel %vm184_vm4, %v540_v44, %v337_v45 }
 0x111   :  { %v185_v51 = vsel %vm184_vm4, %v183_v46, %v538_v43 }
 0x112   :  { %483 = vmatmul.mubr.msk.f32.vlgmr.msra.gmra.mrb[4].mxu0 %vm186_vm3, %v185_v51 }
 0x113   :  { %521 = vmatpush3.bf16.msra.mxu0 %v520_v47  ;;  %504 = vmatprep.mubr.msk.f32.mxu0 %vm620_vm0, %v619_v0 }
 0x114   :  { %522 = vmatprep.subr.bf16.mxu0 %v621_v17 }
 0x117   :  { %524 = vmatpush3.bf16.msra.mxu0 %v523_v52 }
 0x11a   :  { %505 = vmatmul.mubr.msk.f32.vlgmr.msra.gmra.mrb[6].mxu0 %vm186_vm3, %v338_v50 }
 0x1e5   :  { %v255_v55 = vpop.f32.mrb[4].mxu0 }
 0x1e6   :  { %v329_v56 = vadd.f32 %v328_v53, %v255_v55  ;;  %v484_v57 = vpop.f32.mrb[5].mxu0 }
 0x1ed   :  { %v407_v58 = vpop.f32.mrb[6].mxu0 }
 0x1ee   :  { %v411_v60 = vadd.f32 %v407_v58, %v329_v56  ;;  %v506_v61 = vpop.f32.mrb[7].mxu0 }
 0x1f0   :  { %v419_v62 = vadd.f32 %v442_v59, %v411_v60 }
 0x1f2   :  { %420 = vst [vmem:[#allocation7] sm:$0x3] %v419_v62 }
 0x1f3   :  { %596 = shalt.err (!%p593_p6)
}
 0x1f4   :  { %s597_s11 = scalar_lea.hbm %s730_s6, 32 }
 0x1f5   :  { %p598_p7 = scmp.ne.s32.totalorder %s730_s6, %s597_s11  ;;  %p601_p8 = scmp.lt.u32.totalorder %s597_s11, %s730_s6 }
 0x1f7   :  { %p603_p9 = pnand %p601_p8, %p598_p7 }
 0x1f9   :  { %606 = shalt.err (!%p603_p9)
}
 0x1fa   :  { %430 = dma.vmem_to_hbm [thread:$0]  %s428_s7, 32, %s730_s6, [#allocation4]  }
 0x1fb   :  { %611 = dma.done.wait [#allocation4], 32  }
 0x1fc   :  { %612 = vsyncadd [#allocation4], 4294967264 }
 0x1fd   :  { %434 = vsyncpa [#allocation3], 1 }
 0x1fe   :  { %435 = vsyncpa [#allocation6], 1 }
 0x1ff   :  { %436 = vsyncpa [#allocation4], 1 }

</bundles_post_ra>
